<compile_context>
chip_gen: v7x
topology: tpu7x:2x2x1
jax: 0.10.0
libtpu: 0.0.40
codegen_flags: <defaults>
</compile_context>

<pallas_src>
import functools

import jax
import jax.numpy as jnp
from jax.experimental import pallas as pl
from jax.experimental.pallas import tpu as pltpu


def channel_gate_kernel(x_ref, w1_ref, b1_ref, w2_ref, b2_ref, o_ref, *, s_true):
    """One block of TB batch elements per grid step.

    x_ref, o_ref : (TB, C, S_pad)  native dtype (spatial on the lane axis,
                                    zero-padded to a multiple of 128)
    w1_ref       : (Cr, C)  f32   (PyTorch nn.Linear weight layout)
    b1_ref       : (Cr, 1)  f32
    w2_ref       : (C, Cr)  f32
    b2_ref       : (C, 1)   f32
    s_true       : static int, true H*W (<= S_pad)
    """
    x = x_ref[...]                                    # (TB, C, S_pad)
    tb, _, s_pad = x.shape

    if s_pad != s_true:
        lane = jax.lax.broadcasted_iota(jnp.int32, (1, 1, s_pad), 2)
        valid = lane < s_true
        x_for_max = jnp.where(valid, x, jnp.array(-jnp.inf, dtype=x.dtype))
    else:
        x_for_max = x

    # Global average / max pooling along the spatial (lane) axis.
    # Zero padding is harmless for the sum; mean uses the true spatial count.
    avg = jnp.sum(x, axis=-1, dtype=jnp.float32) * (1.0 / s_true)      # (TB, C)
    mx = jnp.max(x_for_max, axis=-1).astype(jnp.float32)               # (TB, C)

    # Pack all pooled vectors of the block into one RHS: (C, 2*TB).
    pooled = jnp.concatenate([avg, mx], axis=0).T                      # (C, 2*TB)

    # Shared two-layer MLP, one pair of matmuls per grid step.
    h = jnp.dot(w1_ref[...], pooled, preferred_element_type=jnp.float32)
    h = jnp.clip(h + b1_ref[...], 0.0, 6.0)                            # ReLU6, (Cr, 2*TB)
    att = jnp.dot(w2_ref[...], h, preferred_element_type=jnp.float32) + b2_ref[...]

    att_sum = att[:, :tb] + att[:, tb:]                                # (C, TB)
    scale = jax.nn.sigmoid(att_sum)                                    # (C, TB) f32
    scale_t = scale.T[:, :, None]                                      # (TB, C, 1)

    # Gate multiply in f32, single cast at the store (matches reference order).
    o_ref[...] = (x.astype(jnp.float32) * scale_t).astype(o_ref.dtype)


def _vmem_capacity_bytes():
    try:
        return int(pltpu.get_tpu_info().vmem_capacity_bytes)
    except Exception:
        return 64 << 20  # conservative fallback (v7x per-TensorCore)


def channel_gate(x_nchw, w1, b1, w2, b2, *, inplace=False):
    """CBAM ChannelGate forward.

    x_nchw : (B, C, H, W)
    w1     : (Cr, C),  b1: (Cr,)   first Linear  (PyTorch layout)
    w2     : (C, Cr),  b2: (C,)    second Linear (PyTorch layout)
    """
    B, C, H, W = x_nchw.shape
    S = H * W
    S_pad = ((S + 127) // 128) * 128                 # lane-dense last dim
    Cr = w1.shape[0]

    x3 = x_nchw.reshape(B, C, S)
    if S_pad != S:
        x3 = jnp.pad(x3, ((0, 0), (0, 0), (0, S_pad - S)))

    w1f = w1.astype(jnp.float32)
    w2f = w2.astype(jnp.float32)
    b1c = b1.reshape(Cr, 1).astype(jnp.float32)
    b2c = b2.reshape(C, 1).astype(jnp.float32)

    # ---- batch-block (TB) sizing, generation aware -------------------------
    vmem_cap = _vmem_capacity_bytes()
    vmem_cap_safe = (vmem_cap * 3) // 4              # headroom for compiler scratch

    itemsize = jnp.dtype(x_nchw.dtype).itemsize
    slab_per_batch = C * S_pad * itemsize
    wbytes = 4 * (w1f.size + b1c.size + w2f.size + b2c.size)

    # Target per-step block ~ vmem/16 (≈8 MiB on 128 MiB parts, ≈4 MiB on v7x).
    target_block = max(1 << 20, vmem_cap // 16)
    tb = max(1, min(B, target_block // max(1, slab_per_batch)))
    while tb > 1 and B % tb:
        tb -= 1

    def step_bytes(t):
        # double-buffered input + output blocks, weights (x2 buffers), headroom
        return 4 * t * slab_per_batch + 2 * wbytes + (4 << 20)

    while tb > 1 and step_bytes(tb) > vmem_cap_safe:
        tb -= 1
        while tb > 1 and B % tb:
            tb -= 1

    # Prefer >=2 grid steps (megacore on multi-TC parts) when blocks stay big.
    if tb == B and B >= 2 and (B // 2) * slab_per_batch >= (1 << 19):
        tb = B // 2
        while tb > 1 and B % tb:
            tb -= 1

    # TODO(synk): if even tb == 1 overflows the VMEM budget (very large C*S,
    # mainly on v7x's 64 MiB), additionally tile the spatial axis in-kernel
    # with f32 running sum/max scratch instead of whole-slab pooling.

    vmem_limit = int(min(max(step_bytes(tb), 32 << 20), vmem_cap_safe))
    grid = (B // tb,)

    kernel = functools.partial(channel_gate_kernel, s_true=S)

    out = pl.pallas_call(
        kernel,
        out_shape=jax.ShapeDtypeStruct((B, C, S_pad), x_nchw.dtype),
        grid_spec=pltpu.PrefetchScalarGridSpec(
            num_scalar_prefetch=0,
            grid=grid,
            in_specs=[
                pl.BlockSpec((tb, C, S_pad), lambda b: (b, 0, 0)),
                pl.BlockSpec((Cr, C), lambda b: (0, 0)),
                pl.BlockSpec((Cr, 1), lambda b: (0, 0)),
                pl.BlockSpec((C, Cr), lambda b: (0, 0)),
                pl.BlockSpec((C, 1), lambda b: (0, 0)),
            ],
            out_specs=pl.BlockSpec((tb, C, S_pad), lambda b: (b, 0, 0)),
        ),
        compiler_params=pltpu.CompilerParams(
            dimension_semantics=("parallel",),
            vmem_limit_bytes=vmem_limit,
        ),
        input_output_aliases=({0: 0} if inplace else {}),
    )(x3, w1f, b1c, w2f, b2c)

    if S_pad != S:
        out = out[:, :, :S]
    return out.reshape(B, C, H, W)


def init_params(key, gate_channels, reduction_ratio):
    # Deterministic init mimicking nn.Linear default (uniform +/- 1/sqrt(fan_in)),
    # parameters kept in PyTorch (out, in) layout.
    cr = gate_channels // reduction_ratio
    k1, k2, k3, k4 = jax.random.split(key, 4)
    bound1 = 1.0 / (gate_channels ** 0.5)
    bound2 = 1.0 / (cr ** 0.5)
    w1 = jax.random.uniform(k1, (cr, gate_channels), jnp.float32, -bound1, bound1)
    b1 = jax.random.uniform(k2, (cr,), jnp.float32, -bound1, bound1)
    w2 = jax.random.uniform(k3, (gate_channels, cr), jnp.float32, -bound2, bound2)
    b2 = jax.random.uniform(k4, (gate_channels,), jnp.float32, -bound2, bound2)
    return w1, b1, w2, b2


def channel_gate_reference(x_nchw, w1, b1, w2, b2):
    # Pure-JAX reference mirroring the PyTorch module.
    xf = x_nchw.astype(jnp.float32)
    avg_pool = jnp.mean(xf, axis=(2, 3))
    max_pool = jnp.max(xf, axis=(2, 3))

    def mlp(p):
        h = jnp.clip(p @ w1.T + b1, 0.0, 6.0)
        return h @ w2.T + b2

    att = mlp(avg_pool) + mlp(max_pool)
    scale = jax.nn.sigmoid(att)[:, :, None, None]
    return (xf * scale).astype(x_nchw.dtype)


def _run_case(key, B, C, H, W, reduction_ratio):
    kx, kp = jax.random.split(key)
    x = jax.random.normal(kx, (B, C, H, W), jnp.float32)
    w1, b1, w2, b2 = init_params(kp, C, reduction_ratio)

    out = jax.block_until_ready(channel_gate(x, w1, b1, w2, b2))
    ref = channel_gate_reference(x, w1, b1, w2, b2)

    assert out.shape == (B, C, H, W)
    assert jnp.allclose(out, ref, atol=1e-5, rtol=1e-5), float(
        jnp.max(jnp.abs(out - ref))
    )


if __name__ == "__main__":
    key = jax.random.PRNGKey(0)
    k1, k2 = jax.random.split(key)

    # Case 1: lane-dense spatial (S = 256), batch-blocked grid.
    _run_case(k1, B=2, C=64, H=16, W=16, reduction_ratio=16)

    # Case 2: non-128-multiple spatial (S = 100 -> padded to 128) exercises the
    # masked max / true-count mean path.
    _run_case(k2, B=3, C=32, H=10, W=10, reduction_ratio=8)

    print("KERNEL_OK")
</pallas_src>

<mosaic_0001>
module attributes {stable_mosaic.version = 11 : i64} {
  func.func @channel_gate_kernel(%arg0: i32, %arg1: memref<2x64x256xf32, #tpu.memory_space<vmem>>, %arg2: memref<4x64xf32, #tpu.memory_space<vmem>>, %arg3: memref<4x1xf32, #tpu.memory_space<vmem>>, %arg4: memref<64x4xf32, #tpu.memory_space<vmem>>, %arg5: memref<64x1xf32, #tpu.memory_space<vmem>>, %arg6: memref<2x64x256xf32, #tpu.memory_space<vmem>>) attributes {dimension_semantics = [#tpu.dimension_semantics<parallel>], iteration_bounds = array<i64: 1>, scalar_prefetch = 0 : i64, scratch_operands = 0 : i64, tpu.core_type = #tpu.core_type<tc>, window_params = [{transform_indices = @transform_0, window_bounds = array<i64: 2, 64, 256>}, {pipeline_mode = #tpu.pipeline_mode<synchronous>, transform_indices = @transform_1, window_bounds = array<i64: 4, 64>}, {pipeline_mode = #tpu.pipeline_mode<synchronous>, transform_indices = @transform_2, window_bounds = array<i64: 4, 1>}, {pipeline_mode = #tpu.pipeline_mode<synchronous>, transform_indices = @transform_3, window_bounds = array<i64: 64, 4>}, {pipeline_mode = #tpu.pipeline_mode<synchronous>, transform_indices = @transform_4, window_bounds = array<i64: 64, 1>}, {transform_indices = @transform_5, window_bounds = array<i64: 2, 64, 256>}]} {
    %c0 = arith.constant 0 : index
    %c0_0 = arith.constant 0 : index
    %c0_1 = arith.constant 0 : index
    %0 = vector.load %arg1[%c0, %c0_0, %c0_1] : memref<2x64x256xf32, #tpu.memory_space<vmem>>, vector<2x64x256xf32>
    %cst = arith.constant dense<0.000000e+00> : vector<2x64xf32>
    %1 = vector.multi_reduction <add>, %0, %cst [2] : vector<2x64x256xf32> to vector<2x64xf32>
    %cst_2 = arith.constant 3.906250e-03 : f32
    %2 = vector.broadcast %cst_2 : f32 to vector<2x64xf32>
    %3 = arith.mulf %1, %2 : vector<2x64xf32>
    %cst_3 = arith.constant dense<0xFF800000> : vector<2x64xf32>
    %4 = vector.multi_reduction <maximumf>, %0, %cst_3 [2] : vector<2x64x256xf32> to vector<2x64xf32>
    %5 = tpu.concatenate %3, %4 in 0 : vector<2x64xf32>, vector<2x64xf32> -> vector<4x64xf32>
    %6 = tpu.transpose %5, [1, 0] : vector<4x64xf32> -> vector<64x4xf32>
    %c0_4 = arith.constant 0 : index
    %c0_5 = arith.constant 0 : index
    %7 = vector.load %arg2[%c0_4, %c0_5] : memref<4x64xf32, #tpu.memory_space<vmem>>, vector<4x64xf32>
    %cst_6 = arith.constant dense<0.000000e+00> : vector<4x4xf32>
    %8 = tpu.matmul %7, %6, %cst_6 {dimension_numbers = #tpu.dot_dimension_numbers<[1], [0], [0], [1], [0, 0, 1, 1], [], []>} : vector<4x64xf32>, vector<64x4xf32>, vector<4x4xf32> -> vector<4x4xf32>
    %c0_7 = arith.constant 0 : index
    %c0_8 = arith.constant 0 : index
    %9 = vector.load %arg3[%c0_7, %c0_8] : memref<4x1xf32, #tpu.memory_space<vmem>>, vector<4x1xf32>
    %10 = vector.broadcast %9 : vector<4x1xf32> to vector<4x4xf32>
    %11 = arith.addf %8, %10 : vector<4x4xf32>
    %cst_9 = arith.constant 0.000000e+00 : f32
    %cst_10 = arith.constant 6.000000e+00 : f32
    %12 = vector.broadcast %cst_9 : f32 to vector<4x4xf32>
    %13 = arith.maximumf %12, %11 : vector<4x4xf32>
    %14 = vector.broadcast %cst_10 : f32 to vector<4x4xf32>
    %15 = arith.minimumf %14, %13 : vector<4x4xf32>
    %c0_11 = arith.constant 0 : index
    %c0_12 = arith.constant 0 : index
    %16 = vector.load %arg4[%c0_11, %c0_12] : memref<64x4xf32, #tpu.memory_space<vmem>>, vector<64x4xf32>
    %cst_13 = arith.constant dense<0.000000e+00> : vector<64x4xf32>
    %17 = tpu.matmul %16, %15, %cst_13 {dimension_numbers = #tpu.dot_dimension_numbers<[1], [0], [0], [1], [0, 0, 1, 1], [], []>} : vector<64x4xf32>, vector<4x4xf32>, vector<64x4xf32> -> vector<64x4xf32>
    %c0_14 = arith.constant 0 : index
    %c0_15 = arith.constant 0 : index
    %18 = vector.load %arg5[%c0_14, %c0_15] : memref<64x1xf32, #tpu.memory_space<vmem>>, vector<64x1xf32>
    %19 = vector.broadcast %18 : vector<64x1xf32> to vector<64x4xf32>
    %20 = arith.addf %17, %19 : vector<64x4xf32>
    %21 = vector.extract_strided_slice %20 {offsets = [0, 0], sizes = [64, 2], strides = [1, 1]} : vector<64x4xf32> to vector<64x2xf32>
    %22 = vector.extract_strided_slice %20 {offsets = [0, 2], sizes = [64, 2], strides = [1, 1]} : vector<64x4xf32> to vector<64x2xf32>
    %23 = arith.addf %21, %22 : vector<64x2xf32>
    %24 = arith.negf %23 : vector<64x2xf32>
    %25 = math.exp %24 : vector<64x2xf32>
    %cst_16 = arith.constant 1.000000e+00 : f32
    %26 = vector.broadcast %cst_16 : f32 to vector<64x2xf32>
    %27 = arith.addf %26, %25 : vector<64x2xf32>
    %28 = arith.divf %26, %27 : vector<64x2xf32>
    %29 = tpu.transpose %28, [1, 0] : vector<64x2xf32> -> vector<2x64xf32>
    %30 = vector.shape_cast %29 : vector<2x64xf32> to vector<2x64x1xf32>
    %31 = vector.broadcast %30 : vector<2x64x1xf32> to vector<2x64x256xf32>
    %32 = arith.mulf %0, %31 : vector<2x64x256xf32>
    %c0_17 = arith.constant 0 : index
    %c0_18 = arith.constant 0 : index
    %c0_19 = arith.constant 0 : index
    %33 = vector.load %arg6[%c0_17, %c0_18, %c0_19] : memref<2x64x256xf32, #tpu.memory_space<vmem>>, vector<2x64x256xf32>
    tpu.vector_store %arg6[%c0_17, %c0_18, %c0_19], %32 {strides = array<i32>} : memref<2x64x256xf32, #tpu.memory_space<vmem>>, vector<2x64x256xf32>,
    return
  }
  func.func @transform_0(%arg0: i32) -> (i32, i32, i32) {
    %c0_i32 = arith.constant 0 : i32
    %c0_i32_0 = arith.constant 0 : i32
    %c0_i32_1 = arith.constant 0 : i32
    return %arg0, %c0_i32, %c0_i32_0 : i32, i32, i32
  }
  func.func @transform_1(%arg0: i32) -> (i32, i32) {
    %c0_i32 = arith.constant 0 : i32
    %c0_i32_0 = arith.constant 0 : i32
    %c0_i32_1 = arith.constant 0 : i32
    return %c0_i32, %c0_i32_0 : i32, i32
  }
  func.func @transform_2(%arg0: i32) -> (i32, i32) {
    %c0_i32 = arith.constant 0 : i32
    %c0_i32_0 = arith.constant 0 : i32
    %c0_i32_1 = arith.constant 0 : i32
    return %c0_i32, %c0_i32_0 : i32, i32
  }
  func.func @transform_3(%arg0: i32) -> (i32, i32) {
    %c0_i32 = arith.constant 0 : i32
    %c0_i32_0 = arith.constant 0 : i32
    %c0_i32_1 = arith.constant 0 : i32
    return %c0_i32, %c0_i32_0 : i32, i32
  }
  func.func @transform_4(%arg0: i32) -> (i32, i32) {
    %c0_i32 = arith.constant 0 : i32
    %c0_i32_0 = arith.constant 0 : i32
    %c0_i32_1 = arith.constant 0 : i32
    return %c0_i32, %c0_i32_0 : i32, i32
  }
  func.func @transform_5(%arg0: i32) -> (i32, i32, i32) {
    %c0_i32 = arith.constant 0 : i32
    %c0_i32_0 = arith.constant 0 : i32
    %c0_i32_1 = arith.constant 0 : i32
    return %arg0, %c0_i32, %c0_i32_0 : i32, i32, i32
  }
}

</mosaic_0001>

<bundles_post_ra>
// kernel: tpu_custom_call.1
= control target key start
LH: loop header
LB: loop body
LE: loop exit
PB: predicated region body
PF: predicated region fallthrough
CT: control target
= control target key end

     0   :  { %10 = vsyncpa [#allocation3], 0  ;;  %s1489_s0 = inlined_call_operand.hbm [shape: f32[2,64,256], index: 0, kind: input, shape index: {}]   ;;  %s1490_s1 = inlined_call_operand.vmem [shape: f32[4,64], index: 1, kind: input, shape index: {}]   ;;  %s1491_s2 = inlined_call_operand.vmem [shape: f32[4,1], index: 2, kind: input, shape index: {}]   ;;  %s1492_s3 = inlined_call_operand.vmem [shape: f32[64,4], index: 3, kind: input, shape index: {}]   ;;  %s1493_s4 = inlined_call_operand.vmem [shape: f32[64,1], index: 4, kind: input, shape index: {}]   ;;  %s1494_s5 = inlined_call_operand.hbm [shape: f32[2,64,256], index: 5, kind: output, shape index: {}]  }
   0x1   :  { %11 = vsyncpa [#allocation4], 0  ;;  %s1079_s18 = smov [#allocation2]   ;;  %s1031_s22 = scalar_lea.hbm %s1489_s0, 4096 }
   0x2   :  { %s17_s19 = sshll.u32 %s1079_s18, 4  ;;  %p1032_p0 = scmp.ne.s32.totalorder %s1489_s0, %s1031_s22  ;;  %s18_s19 = int_to_ptr.vmem [resolvable:$true] %s17_s19 }
   0x3   :  { %p1035_p1 = scmp.lt.u32.totalorder %s1031_s22, %s1489_s0 }
   0x5   :  { %p1037_p2 = pnand %p1035_p1, %p1032_p0 }
   0x7   :  { %1040 = shalt.err (!%p1037_p2)
}
   0x8   :  { %s1041_s27 = scalar_lea.vmem %s18_s19, 4096  ;;  %p1046_p4 = scmp.lt.s32.totalorder %s18_s19, %s18_s19 }
   0x9   :  { %p1042_p3 = scmp.ne.s32.totalorder %s18_s19, %s1041_s27  ;;  %p1047_p5 = scmp.lt.s32.totalorder %s1041_s27, %s1041_s27 }
   0xb   :  { %p1048_p6 = por %p1047_p5, %p1046_p4 }
   0xd   :  { %p1049_p7 = pnand %p1048_p6, %p1042_p3 }
   0xf   :  { %1052 = shalt.err (!%p1049_p7)
}
  0x10   :  { %s1080_s28 = smov 256   ;;  %s1081_s29 = smov 16  }
  0x11   :  { %23 = dma.hbm_to_vmem [thread:$0]  %s1489_s0, 4096, %s18_s19, [#allocation3], %s1080_s28, %s1080_s28, %s1081_s29  }
  0x12   :  { %1075 = dma.done.wait [#allocation3], 4096  }
  0x13   :  { %1076 = vsyncadd [#allocation3], 4294963200  ;;  %v1132_v0 = vld [vmem:[#allocation2 + $0x80] sm:$0xff]  ;;  %v1134_v1 = vld [vmem:[#allocation2 + $0x88] sm:$0xff]  ;;  %vm1083_vm0 = vmmov 0   ;;  %vm206_vm1 = vcmask 130112  }
  0x14   :  { %1508 = vst [vmem:[#allocation8_spill] sm:$0xff] %v1134_v1  ;;  %v1136_v2 = vld [vmem:[#allocation2] sm:$0xff]  ;;  %v91_v3 = vadd.f32 %v1134_v1, %v1132_v0  ;;  %v1140_v4 = vld [vmem:[#allocation2 + $0x8] sm:$0xff]  ;;  %v1142_v5 = vld [vmem:[#allocation2 + $0x90] sm:$0xff]  ;;  %v155_v27 = vmax.f32 %v1132_v0, %v1134_v1  ;;  %vm213_vm2 = vcmask 195712   ;;  %vm220_vm3 = vcmask 261312  }
  0x15   :  { %1509 = vst [vmem:[#allocation9_spill] sm:$0xff] %v1142_v5  ;;  %v1144_v6 = vld [vmem:[#allocation2 + $0x98] sm:$0xff]  ;;  %v67_v7 = vadd.f32 %v1140_v4, %v1136_v2  ;;  %v1148_v8 = vld [vmem:[#allocation2 + $0x10] sm:$0xff]  ;;  %v1156_v12 = vld [vmem:[#allocation2 + $0xa0] sm:$0xff]  ;;  %v131_v25 = vmax.f32 %v1136_v2, %v1140_v4  ;;  %vm227_vm4 = vcmask 326912   ;;  %vm234_vm5 = vcmask 392512  }
  0x16   :  { %1510 = vst [vmem:[#allocation10_spill] sm:$0xff] %v1144_v6  ;;  %v1150_v9 = vld [vmem:[#allocation2 + $0x18] sm:$0xff]  ;;  %92 = vadd.xlane.f32.xlu1 %v91_v3  ;;  %v94_v10 = vadd.f32 %v1144_v6, %v1142_v5  ;;  %1511 = vst [vmem:[#allocation11_spill] sm:$0xff] %v1156_v12  ;;  %v1158_v13 = vld [vmem:[#allocation2 + $0xa8] sm:$0xff]  ;;  %v158_v26 = vmax.f32 %v1142_v5, %v1144_v6  ;;  %v1082_v3 = vmov 0.0   ;;  %vm241_vm6 = vcmask 458112  }
  0x17   :  { %68 = vadd.xlane.f32.xlu0 %v67_v7  ;;  %v70_v11 = vadd.f32 %v1150_v9, %v1148_v8  ;;  %1512 = vst [vmem:[#allocation12_spill] sm:$0xff] %v1158_v13  ;;  %v1160_v14 = vld [vmem:[#allocation2 + $0x20] sm:$0xff]  ;;  %v1162_v15 = vld [vmem:[#allocation2 + $0x28] sm:$0xff]  ;;  %v97_v16 = vadd.f32 %v1158_v13, %v1156_v12  ;;  %v1168_v18 = vld [vmem:[#allocation2 + $0xb0] sm:$0xff]  ;;  %v134_v24 = vmax.f32 %v1148_v8, %v1150_v9  ;;  %vm248_vm7 = vcmask 523712   ;;  %s1085_s14 = smov 126  }
  0x18   :  { %v73_v17 = vadd.f32 %v1162_v15, %v1160_v14  ;;  %1513 = vst [vmem:[#allocation13_spill] sm:$0xff] %v1168_v18  ;;  %v1170_v19 = vld [vmem:[#allocation2 + $0xb8] sm:$0xff]  ;;  %v1172_v20 = vld [vmem:[#allocation2 + $0x30] sm:$0xff]  ;;  %v1188_v28 = vld [vmem:[#allocation2 + $0xc0] sm:$0xff]  ;;  %v161_v34 = vmax.f32 %v1156_v12, %v1158_v13  ;;  %v137_v35 = vmax.f32 %v1160_v14, %v1162_v15  ;;  %968 = vmatprep.subr.mxu0 %v1082_v3  ;;  %vm289_vm8 = vcmask 1041409  }
  0x19   :  { %1514 = vst [vmem:[#allocation14_spill] sm:$0xff] %v1170_v19  ;;  %v1174_v21 = vld [vmem:[#allocation2 + $0x38] sm:$0xff]  ;;  %v100_v22 = vadd.f32 %v1170_v19, %v1168_v18  ;;  %1515 = vst [vmem:[#allocation15_spill] sm:$0xff] %v1188_v28  ;;  %v1190_v29 = vld [vmem:[#allocation2 + $0xc8] sm:$0xff]  ;;  %v164_v42 = vmax.f32 %v1168_v18, %v1170_v19  ;;  %970 = vmatprep.mubr.msk.f32.mxu0 %vm1083_vm0, %v1082_v3  ;;  %vm386_vm9 = vcmask 1043459   ;;  %vm389_vm10 = vcmask 1041408  }
  0x1a   :  { %95 = vadd.xlane.f32.xlu1 %v94_v10  ;;  %v76_v23 = vadd.f32 %v1174_v21, %v1172_v20  ;;  %1516 = vst [vmem:[#allocation16_spill] sm:$0xff] %v1190_v29  ;;  %v1192_v30 = vld [vmem:[#allocation2 + $0x40] sm:$0xff]  ;;  %v1194_v31 = vld [vmem:[#allocation2 + $0x48] sm:$0xff]  ;;  %v103_v32 = vadd.f32 %v1190_v29, %v1188_v28  ;;  %v1204_v36 = vld [vmem:[#allocation2 + $0xd0] sm:$0xff]  ;;  %v140_v43 = vmax.f32 %v1172_v20, %v1174_v21  ;;  %v1084_v10 = vmov 0  }
  0x1b   :  { %71 = vadd.xlane.f32.xlu0 %v70_v11  ;;  %v79_v33 = vadd.f32 %v1194_v31, %v1192_v30  ;;  %1517 = vst [vmem:[#allocation17_spill] sm:$0xff] %v1204_v36  ;;  %v1206_v37 = vld [vmem:[#allocation2 + $0xd8] sm:$0xff]  ;;  %v1208_v38 = vld [vmem:[#allocation2 + $0x50] sm:$0xff]  ;;  %v1220_v44 = vld [vmem:[#allocation2 + $0xe0] sm:$0xff]  ;;  %v167_v50 = vmax.f32 %v1188_v28, %v1190_v29  ;;  %v143_v51 = vmax.f32 %v1192_v30, %v1194_v31  ;;  %vm398_vm11 = vcmask 523264  }
  0x1c   :  { %1518 = vst [vmem:[#allocation18_spill] sm:$0xff] %v1206_v37  ;;  %v1210_v39 = vld [vmem:[#allocation2 + $0x58] sm:$0xff]  ;;  %v106_v40 = vadd.f32 %v1206_v37, %v1204_v36  ;;  %1519 = vst [vmem:[#allocation19_spill] sm:$0xff] %v1220_v44  ;;  %v1222_v45 = vld [vmem:[#allocation2 + $0xe8] sm:$0xff]  ;;  %v170_v58 = vmax.f32 %v1204_v36, %v1206_v37  ;;  %997 = vset.pattern.permute.xlu0 %v1084_v10  ;;  %998 = vset.pattern.permute.xlu1 %v1084_v10  ;;  %vm533_vm12 = vcmask 31744   ;;  %vm558_vm13 = vcmask 1043456  }
  0x1d   :  { %v82_v41 = vadd.f32 %v1210_v39, %v1208_v38  ;;  %1520 = vst [vmem:[#allocation20_spill] sm:$0xff] %v1222_v45  ;;  %v1224_v46 = vld [vmem:[#allocation2 + $0x60] sm:$0xff]  ;;  %v1226_v47 = vld [vmem:[#allocation2 + $0x68] sm:$0xff]  ;;  %v109_v48 = vadd.f32 %v1222_v45, %v1220_v44  ;;  %v1236_v52 = vld [vmem:[#allocation2 + $0xf0] sm:$0xff]  ;;  %v146_v59 = vmax.f32 %v1208_v38, %v1210_v39  ;;  %v173_v60 = vmax.f32 %v1220_v44, %v1222_v45 }
  0x1e   :  { %98 = vadd.xlane.f32.xlu1 %v97_v16  ;;  %v85_v49 = vadd.f32 %v1226_v47, %v1224_v46  ;;  %v1238_v53 = vld [vmem:[#allocation2 + $0xf8] sm:$0xff]  ;;  %v1240_v54 = vld [vmem:[#allocation2 + $0x70] sm:$0xff]  ;;  %v149_v61 = vmax.f32 %v1224_v46, %v1226_v47  ;;  %v392_v7 = vld [vmem:[%s1491_s2] sm:$0xf] }
  0x1f   :  { %74 = vadd.xlane.f32.xlu0 %v73_v17  ;;  %v1242_v55 = vld [vmem:[#allocation2 + $0x78] sm:$0xff]  ;;  %v112_v56 = vadd.f32 %v1238_v53, %v1236_v52  ;;  %v176_v62 = vmax.f32 %v1236_v52, %v1238_v53 }
  0x20   :  { %v88_v57 = vadd.f32 %v1242_v55, %v1240_v54  ;;  %v152_v63 = vmax.f32 %v1240_v54, %v1242_v55 }
  0x22   :  { %101 = vadd.xlane.f32.xlu1 %v100_v22 }
  0x23   :  { %77 = vadd.xlane.f32.xlu0 %v76_v23 }
  0x26   :  { %135 = vmax.xlane.f32.xlu1 %v134_v24 }
  0x27   :  { %132 = vmax.xlane.f32.xlu0 %v131_v25 }
  0x2a   :  { %159 = vmax.xlane.f32.xlu1 %v158_v26 }
  0x2b   :  { %156 = vmax.xlane.f32.xlu0 %v155_v27 }
  0x2e   :  { %104 = vadd.xlane.f32.xlu1 %v103_v32 }
  0x2f   :  { %80 = vadd.xlane.f32.xlu0 %v79_v33 }
  0x32   :  { %162 = vmax.xlane.f32.xlu1 %v161_v34 }
  0x33   :  { %138 = vmax.xlane.f32.xlu0 %v137_v35 }
  0x36   :  { %107 = vadd.xlane.f32.xlu1 %v106_v40 }
  0x37   :  { %83 = vadd.xlane.f32.xlu0 %v82_v41 }
  0x3a   :  { %165 = vmax.xlane.f32.xlu1 %v164_v42 }
  0x3b   :  { %141 = vmax.xlane.f32.xlu0 %v140_v43  ;;  %v195_v43 = vlaneseq }
  0x3e   :  { %110 = vadd.xlane.f32.xlu1 %v109_v48 }
  0x3f   :  { %86 = vadd.xlane.f32.xlu0 %v85_v49 }
  0x42   :  { %168 = vmax.xlane.f32.xlu1 %v167_v50  ;;  %v196_v50 = vand.u32 127, %v195_v43 }
  0x43   :  { %144 = vmax.xlane.f32.xlu0 %v143_v51  ;;  %v1275_v51 = vshrl.u32 %v195_v43, 7 }
  0x44   :  { %v222_v45 = vadd.s32 4294967264, %v196_v50  ;;  %v229_v44 = vadd.s32 4294967256, %v196_v50  ;;  %v236_v28 = vadd.s32 4294967248, %v196_v50 }
  0x46   :  { %113 = vadd.xlane.f32.xlu1 %v112_v56 }
  0x47   :  { %89 = vadd.xlane.f32.xlu0 %v88_v57  ;;  %v201_v57 = vadd.s32 4294967288, %v196_v50 }
  0x4a   :  { %171 = vmax.xlane.f32.xlu1 %v170_v58  ;;  %v208_v58 = vadd.s32 4294967280, %v196_v50 }
  0x4b   :  { %147 = vmax.xlane.f32.xlu0 %v146_v59 }
  0x4e   :  { %174 = vmax.xlane.f32.xlu1 %v173_v60  ;;  %v215_v60 = vadd.s32 4294967272, %v196_v50 }
  0x4f   :  { %150 = vmax.xlane.f32.xlu0 %v149_v61  ;;  %v1282_v61 = vsub.s32 %v196_v50, %v1275_v51 }
  0x50   :  { %v1291_v29 = vsub.s32 %v215_v60, %v1275_v51 }
  0x52   :  { %177 = vmax.xlane.f32.xlu1 %v176_v62 }
  0x53   :  { %153 = vmax.xlane.f32.xlu0 %v152_v63  ;;  %v1285_v63 = vsub.s32 %v201_v57, %v1275_v51 }
  0x69   :  { %395 = vperm.xlu0 %997, %v392_v7   ;;  %v1288_v7 = vsub.s32 %v208_v58, %v1275_v51 }
  0xa3   :  { %v93_v11 = vpop.xlane.xlu1 %92 }
  0xa4   :  { %v69_v16 = vpop.xlane.xlu0 %68  ;;  %v123_v37 = vmul.f32 0.00390625, %v93_v11 }
  0xa5   :  { %v115_v19 = vmul.f32 0.00390625, %v69_v16  ;;  %v1303_v16 = vsub.s32 %v229_v44, %v1275_v51 }
  0xa7   :  { %v96_v17 = vpop.xlane.xlu1 %95 }
  0xa8   :  { %v72_v22 = vpop.xlane.xlu0 %71  ;;  %v124_v3 = vmul.f32 0.00390625, %v96_v17  ;;  %v243_v17 = vadd.s32 4294967240, %v196_v50 }
  0xa9   :  { %v116_v43 = vmul.f32 0.00390625, %v72_v22 }
  0xaa   :  { %v257_v58 = vrot.slane %v124_v3, %v1285_v63  ;;  %v1308_v3 = vsub.s32 %v236_v28, %v1275_v51 }
  0xab   :  { %v99_v23 = vpop.xlane.xlu1 %98  ;;  %v205_v11 = vrot.slane %v116_v43, %v1285_v63 }
  0xac   :  { %v75_v24 = vpop.xlane.xlu0 %74  ;;  %v125_v36 = vmul.f32 0.00390625, %v99_v23  ;;  %v1300_v23 = vsub.s32 %v222_v45, %v1275_v51  ;;  %v1314_v45 = vsub.s32 %v243_v17, %v1275_v51 }
  0xad   :  { %v117_v18 = vmul.f32 0.00390625, %v75_v24  ;;  %v253_v24 = vrot.slane %v123_v37, %v1282_v61 }
  0xaf   :  { %v102_v25 = vpop.xlane.xlu1 %101  ;;  %v212_v6 = vrot.slane %v117_v18, %v1288_v7 }
  0xb0   :  { %v78_v26 = vpop.xlane.xlu0 %77  ;;  %v126_v57 = vmul.f32 0.00390625, %v102_v25  ;;  %v262_v25 = vrot.slane %v125_v36, %v1288_v7 }
  0xb1   :  { %v118_v12 = vmul.f32 0.00390625, %v78_v26  ;;  %v200_v26 = vrot.slane %v115_v19, %v1282_v61 }
  0xb2   :  { %v267_v43 = vrot.slane %v126_v57, %v1291_v29 }
  0xb3   :  { %v1263_v27 = vpop.xlane.xlu1 %135  ;;  %v219_v37 = vrot.slane %v118_v12, %v1291_v29  ;;  %v207_v18 = vsel %vm206_vm1, %v205_v11, %v200_v26 }
  0xb4   :  { %v1265_v32 = vpop.xlane.xlu0 %132  ;;  %v315_v36 = vrot.slane %v1263_v27, %v1285_v63 }
  0xb5   :  { %v311_v28 = vrot.slane %v1265_v32, %v1282_v61  ;;  %v214_v32 = vsel %vm213_vm2, %v212_v6, %v207_v18 }
  0xb7   :  { %v1267_v33 = vpop.xlane.xlu1 %159 }
  0xb8   :  { %v1269_v34 = vpop.xlane.xlu0 %156 }
  0xb9   :  { %v350_v57 = vrot.slane %v1269_v34, %v1282_v61  ;;  %v316_v34 = vsel %vm206_vm1, %v315_v36, %v311_v28 }
  0xbb   :  { %v105_v35 = vpop.xlane.xlu1 %104 }
  0xbc   :  { %v81_v40 = vpop.xlane.xlu0 %80  ;;  %v127_v60 = vmul.f32 0.00390625, %v105_v35  ;;  %v258_v35 = vsel %vm206_vm1, %v257_v58, %v253_v24 }
  0xbd   :  { %v119_v50 = vmul.f32 0.00390625, %v81_v40  ;;  %v354_v40 = vrot.slane %v1267_v33, %v1285_v63  ;;  %v263_v12 = vsel %vm213_vm2, %v262_v25, %v258_v35  ;;  %v221_v33 = vsel %vm220_vm3, %v219_v37, %v214_v32 }
  0xbe   :  { %v272_v17 = vrot.slane %v127_v60, %v1300_v23  ;;  %v268_v5 = vsel %vm220_vm3, %v267_v43, %v263_v12 }
  0xbf   :  { %v1271_v41 = vpop.xlane.xlu1 %162  ;;  %v226_v27 = vrot.slane %v119_v50, %v1300_v23  ;;  %v355_v25 = vsel %vm206_vm1, %v354_v40, %v350_v57 }
  0xc0   :  { %v1273_v42 = vpop.xlane.xlu0 %138  ;;  %v359_v61 = vrot.slane %v1271_v41, %v1288_v7 }
  0xc1   :  { %v320_v6 = vrot.slane %v1273_v42, %v1288_v7 }
  0xc2   :  { %v360_v35 = vsel %vm213_vm2, %v359_v61, %v355_v25 }
  0xc3   :  { %v108_v48 = vpop.xlane.xlu1 %107 }
  0xc4   :  { %v84_v49 = vpop.xlane.xlu0 %83  ;;  %v128_v58 = vmul.f32 0.00390625, %v108_v48  ;;  %v273_v48 = vsel %vm227_vm4, %v272_v17, %v268_v5 }
  0xc5   :  { %v120_v24 = vmul.f32 0.00390625, %v84_v49 }
  0xc7   :  { %v1277_v56 = vpop.xlane.xlu1 %165  ;;  %v233_v50 = vrot.slane %v120_v24, %v1303_v16 }
  0xc8   :  { %v1279_v59 = vpop.xlane.xlu0 %141  ;;  %v364_v41 = vrot.slane %v1277_v56, %v1291_v29 }
  0xc9   :  { %v325_v43 = vrot.slane %v1279_v59, %v1291_v29  ;;  %v321_v29 = vsel %vm213_vm2, %v320_v6, %v316_v34 }
  0xca   :  { %v365_v57 = vsel %vm220_vm3, %v364_v41, %v360_v35  ;;  %v487_v41 = vld [vmem:[%s1493_s4 + $0x10] sm:$0xff] }
  0xcb   :  { %v111_v62 = vpop.xlane.xlu1 %110 }
  0xcc   :  { %v87_v10 = vpop.xlane.xlu0 %86  ;;  %v129_v11 = vmul.f32 0.00390625, %v111_v62  ;;  %v228_v62 = vsel %vm227_vm4, %v226_v27, %v221_v33 }
  0xcd   :  { %v121_v26 = vmul.f32 0.00390625, %v87_v10  ;;  %v277_v10 = vrot.slane %v128_v58, %v1303_v16  ;;  %v235_v40 = vsel %vm234_vm5, %v233_v50, %v228_v62  ;;  %v479_v62 = vld [vmem:[%s1492_s3 + $0x10] sm:$0xff]  ;;  %v486_v50 = vld [vmem:[%s1493_s4 + $0x8] sm:$0xff] }
  0xce   :  { %v282_v5 = vrot.slane %v129_v11, %v1308_v3  ;;  %978 = vmatprep.mubr.msk.f32.mxu1 %vm533_vm12, %v479_v62 }
  0xcf   :  { %v1293_v13 = vpop.xlane.xlu1 %168 }
  0xd0   :  { %v1296_v22 = vpop.xlane.xlu0 %144  ;;  %v369_v42 = vrot.slane %v1293_v13, %v1300_v23  ;;  %v278_v13 = vsel %vm234_vm5, %v277_v10, %v273_v48  ;;  %v485_v10 = vld [vmem:[%s1493_s4] sm:$0xff] }
  0xd1   :  { %v330_v37 = vrot.slane %v1296_v22, %v1300_v23  ;;  %v326_v23 = vsel %vm220_vm3, %v325_v43, %v321_v29  ;;  %495 = vperm.xlu1 %998, %v485_v10   ;;  %v488_v43 = vld [vmem:[%s1493_s4 + $0x18] sm:$0xff] }
  0xd2   :  { %v370_v12 = vsel %vm227_vm4, %v369_v42, %v365_v57  ;;  %v491_v42 = vld [vmem:[%s1493_s4 + $0x30] sm:$0xff]  ;;  %v484_v57 = vld [vmem:[%s1492_s3 + $0x38] sm:$0xff] }
  0xd3   :  { %v114_v44 = vpop.xlane.xlu1 %113 }
  0xd4   :  { %v90_v19 = vpop.xlane.xlu0 %89  ;;  %v130_v63 = vmul.f32 0.00390625, %v114_v44  ;;  %v240_v44 = vrot.slane %v121_v26, %v1308_v3 }
  0xd5   :  { %v122_v49 = vmul.f32 0.00390625, %v90_v19  ;;  %500 = vperm.xlu1 %998, %v486_v50  }
  0xd6   :  { %v287_v36 = vrot.slane %v130_v63, %v1314_v45  ;;  %v242_v17 = vsel %vm241_vm6, %v240_v44, %v235_v40  ;;  %v490_v44 = vld [vmem:[%s1493_s4 + $0x28] sm:$0xff]  ;;  %v483_v40 = vld [vmem:[%s1492_s3 + $0x30] sm:$0xff] }
  0xd7   :  { %v172_v1 = vpop.xlane.xlu1 %171  ;;  %v247_v59 = vrot.slane %v122_v49, %v1314_v45  ;;  %v477_v49 = vld [vmem:[%s1492_s3] sm:$0xff] }
  0xd8   :  { %v148_v60 = vpop.xlane.xlu0 %147  ;;  %v374_v56 = vrot.slane %v172_v1, %v1303_v16  ;;  %v283_v1 = vsel %vm241_vm6, %v282_v5, %v278_v13  ;;  %v489_v5 = vld [vmem:[%s1493_s4 + $0x20] sm:$0xff]  ;;  %v482_v13 = vld [vmem:[%s1492_s3 + $0x28] sm:$0xff] }
  0xd9   :  { %v335_v19 = vrot.slane %v148_v60, %v1303_v16  ;;  %v331_v16 = vsel %vm227_vm4, %v330_v37, %v326_v23  ;;  %v288_v11 = vsel %vm248_vm7, %v287_v36, %v283_v1  ;;  %v249_v34 = vsel %vm248_vm7, %v247_v59, %v242_v17  ;;  %505 = vperm.xlu1 %998, %v487_v41   ;;  %v478_v59 = vld [vmem:[%s1492_s3 + $0x8] sm:$0xff] }
  0xda   :  { %v375_v58 = vsel %vm234_vm5, %v374_v56, %v370_v12  ;;  %v290_v25 = vsel %vm289_vm8, %v288_v11, %v249_v34 }
  0xdb   :  { %v175_v7 = vpop.xlane.xlu1 %174 }
  0xdc   :  { %v151_v28 = vpop.xlane.xlu0 %150  ;;  %v379_v18 = vrot.slane %v175_v7, %v1308_v3  ;;  %v492_v7 = vld [vmem:[%s1493_s4 + $0x38] sm:$0xff] }
  0xdd   :  { %v340_v22 = vrot.slane %v151_v28, %v1308_v3  ;;  %v336_v3 = vsel %vm234_vm5, %v335_v19, %v331_v16  ;;  %510 = vperm.xlu1 %998, %v488_v43   ;;  %v480_v19 = vld [vmem:[%s1492_s3 + $0x18] sm:$0xff] }
  0xde   :  { %v380_v26 = vsel %vm241_vm6, %v379_v18, %v375_v58  ;;  %v481_v18 = vld [vmem:[%s1492_s3 + $0x20] sm:$0xff]  ;;  %s1086_s3 = smov [#allocation5]  }
  0xdf   :  { %v178_v27 = vpop.xlane.xlu1 %177  ;;  %v341_v61 = vsel %vm241_vm6, %v340_v22, %v336_v3 }
  0xe0   :  { %v384_v24 = vrot.slane %v178_v27, %v1314_v45  ;;  %v154_v32 = vpop.xlane.xlu0 %153 }
  0xe1   :  { %v345_v33 = vrot.slane %v154_v32, %v1314_v45  ;;  %v391_v45 = vld [vmem:[%s1490_s1] sm:$0xf]  ;;  %515 = vperm.xlu1 %998, %v489_v5   ;;  %s926_s1 = sshll.u32 %s1086_s3, 4  ;;  %s927_s1 = int_to_ptr.vmem [resolvable:$true] %s926_s1 }
  0xe2   :  { %v385_v63 = vsel %vm248_vm7, %v384_v24, %v380_v26  ;;  %s1053_s15 = scalar_lea.vmem %s927_s1, 4096  ;;  %p1058_p9 = scmp.lt.s32.totalorder %s927_s1, %s927_s1 }
  0xe3   :  { %v346_v60 = vsel %vm248_vm7, %v345_v33, %v341_v61  ;;  %p1054_p8 = scmp.ne.s32.totalorder %s927_s1, %s1053_s15  ;;  %p1059_p10 = scmp.lt.s32.totalorder %s1053_s15, %s1053_s15 }
  0xe4   :  { %v387_v48 = vsel %vm386_vm9, %v385_v63, %v346_v60 }
  0xe5   :  { %v390_v6 = vsel %vm389_vm10, %v290_v25, %v387_v48  ;;  %520 = vperm.xlu1 %998, %v490_v44   ;;  %p1060_p11 = por %p1059_p10, %p1058_p9 }
  0xe6   :  { %969 = vmatpush3.xpose.msk.msra.mxu0 %vm398_vm11, %v390_v6 }
  0xe7   :  { %p1061_p12 = pnand %p1060_p11, %p1054_p8 }
  0xe8   :  { %v396_v35 = vpop.permute.xlu0 %395 }
  0xe9   :  { %971 = vmatmul.mubr.msk.f32.vlgmr.msra.gmra.mrb[0].mxu0 %vm398_vm11, %v391_v45  ;;  %525 = vperm.xlu1 %998, %v491_v42  }
  0xea   :  { %975 = vmatprep.mubr.msk.f32.mxu0 %vm533_vm12, %v477_v49 }
  0xed   :  { %530 = vperm.xlu1 %998, %v492_v7  }
 0x150   :  { %v496_v22 = vpop.permute.xlu1 %495 }
 0x154   :  { %v501_v23 = vpop.permute.xlu1 %500 }
 0x158   :  { %v506_v1 = vpop.permute.xlu1 %505 }
 0x15c   :  { %v511_v17 = vpop.permute.xlu1 %510 }
 0x160   :  { %v516_v12 = vpop.permute.xlu1 %515 }
 0x164   :  { %v521_v27 = vpop.permute.xlu1 %520 }
 0x168   :  { %v526_v61 = vpop.permute.xlu1 %525 }
 0x16c   :  { %v531_v45 = vpop.permute.xlu1 %530 }
 0x1bc   :  { %v471_v37 = vpop.f32.mrb[0].mxu0 }
 0x1bd   :  { %v472_v36 = vadd.f32 %v471_v37, %v396_v35  ;;  %v972_v56 = vpop.f32.mrb[1].mxu0 }
 0x1bf   :  { %v475_v28 = vmax.f32 %v472_v36, 0.0 }
 0x1c1   :  { %v476_v29 = vmin.f32 %v475_v28, 6.0 }
 0x1c3   :  { %973 = vmatprep.subr.msk.mxu0 %vm558_vm13, %v476_v29  ;;  %987 = vmatprep.subr.msk.mxu1 %vm558_vm13, %v476_v29 }
 0x1c4   :  { %974 = vmatpush3.msk.msra.mxu0 %vm558_vm13, %v476_v29  ;;  %988 = vmatpush3.msk.msra.mxu1 %vm558_vm13, %v476_v29 }
 0x1c5   :  { %976 = vmatmul.mubr.msk.f32.vlgmr.msra.gmra.mrb[2].mxu0 %vm533_vm12, %v478_v59  ;;  %979 = vmatmul.mubr.msk.f32.vlgmr.msra.gmra.mrb[0].mxu1 %vm533_vm12, %v480_v19 }
 0x1c6   :  { %981 = vmatprep.mubr.msk.f32.mxu1 %vm533_vm12, %v481_v18 }
 0x1c9   :  { %982 = vmatmul.mubr.msk.f32.gmra.mrb[2].mxu1 %vm533_vm12, %v482_v13 }
 0x1ca   :  { %984 = vmatprep.mubr.msk.f32.mxu1 %vm533_vm12, %v483_v40 }
 0x1cd   :  { %985 = vmatmul.mubr.msk.f32.gmra.mrb[4].mxu1 %vm533_vm12, %v484_v57 }
 0x298   :  { %v977_v16 = vpop.f32.mrb[2].mxu0  ;;  %v980_v58 = vpop.f32.mrb[0].mxu1 }
 0x299   :  { %v634_v24 = vadd.f32 %v977_v16, %v501_v23  ;;  %v628_v32 = vpop.f32.mrb[3].mxu0  ;;  %v638_v11 = vpop.f32.mrb[1].mxu1  ;;  %v644_v33 = vadd.f32 %v980_v58, %v511_v17 }
 0x29a   :  { %v629_v3 = vadd.f32 %v628_v32, %v496_v22  ;;  %v639_v63 = vadd.f32 %v638_v11, %v506_v1 }
 0x29b   :  { %677 = vrot.lane.b32.xlu1 %v634_v24, %s1085_s14 }
 0x29c   :  { %v983_v26 = vpop.f32.mrb[2].mxu1  ;;  %675 = vrot.lane.b32.xlu0 %v629_v3, %s1085_s14 }
 0x29d   :  { %v648_v34 = vpop.f32.mrb[3].mxu1  ;;  %v654_v25 = vadd.f32 %v983_v26, %v521_v27 }
 0x29e   :  { %v649_v6 = vadd.f32 %v648_v34, %v516_v12 }
 0x29f   :  { %681 = vrot.lane.b32.xlu1 %v644_v33, %s1085_s14 }
 0x2a0   :  { %v986_v60 = vpop.f32.mrb[4].mxu1  ;;  %679 = vrot.lane.b32.xlu0 %v639_v63, %s1085_s14 }
 0x2a1   :  { %v658_v48 = vpop.f32.mrb[5].mxu1  ;;  %v664_v49 = vadd.f32 %v986_v60, %v531_v45 }
 0x2a2   :  { %v659_v62 = vadd.f32 %v658_v48, %v526_v61 }
 0x2a3   :  { %685 = vrot.lane.b32.xlu1 %v654_v25, %s1085_s14 }
 0x2a4   :  { %683 = vrot.lane.b32.xlu0 %v649_v6, %s1085_s14 }
 0x2a7   :  { %689 = vrot.lane.b32.xlu1 %v664_v49, %s1085_s14 }
 0x2a8   :  { %687 = vrot.lane.b32.xlu0 %v659_v62, %s1085_s14 }
 0x30d   :  { %v678_v10 = vpop.permute.xlu1 %677 }
 0x30e   :  { %v700_v50 = vadd.f32 %v678_v10, %v634_v24  ;;  %v676_v41 = vpop.permute.xlu0 %675 }
 0x30f   :  { %v699_v43 = vadd.f32 %v676_v41, %v629_v3 }
 0x310   :  { %v950_v5 = vmul.f32 -1.442695, %v700_v50 }
 0x311   :  { %v949_v44 = vmul.f32 -1.442695, %v699_v43  ;;  %v682_v42 = vpop.permute.xlu1 %681 }
 0x312   :  { %999 = vpow2.f32 %v950_v5  ;;  %v680_v7 = vpop.permute.xlu0 %679  ;;  %v702_v35 = vadd.f32 %v682_v42, %v644_v33  ;;  %v789_v5 = vsub.s32 0, %v1275_v51 }
 0x313   :  { %1001 = vpow2.f32 %v949_v44  ;;  %v701_v37 = vadd.f32 %v680_v7, %v639_v63  ;;  %v824_v44 = vsub.s32 1, %v1275_v51 }
 0x314   :  { %v952_v28 = vmul.f32 -1.442695, %v702_v35 }
 0x315   :  { %v951_v36 = vmul.f32 -1.442695, %v701_v37  ;;  %v686_v59 = vpop.permute.xlu1 %685 }
 0x316   :  { %v684_v56 = vpop.permute.xlu0 %683  ;;  %v704_v19 = vadd.f32 %v686_v59, %v654_v25 }
 0x317   :  { %1003 = vpow2.f32 %v951_v36  ;;  %v703_v29 = vadd.f32 %v684_v56, %v649_v6 }
 0x318   :  { %1005 = vpow2.f32 %v952_v28  ;;  %v954_v23 = vmul.f32 -1.442695, %v704_v19 }
 0x319   :  { %v953_v18 = vmul.f32 -1.442695, %v703_v29  ;;  %v690_v12 = vpop.permute.xlu1 %689 }
 0x31a   :  { %v688_v40 = vpop.permute.xlu0 %687  ;;  %v706_v16 = vadd.f32 %v690_v12, %v664_v49 }
 0x31b   :  { %1007 = vpow2.f32 %v953_v18  ;;  %v705_v1 = vadd.f32 %v688_v40, %v659_v62 }
 0x31c   :  { %v1000_v13 = vpop.eup %999  ;;  %v956_v11 = vmul.f32 -1.442695, %v706_v16 }
 0x31d   :  { %v1002_v57 = vpop.eup %1001  ;;  %v732_v17 = vadd.f32 1.0, %v1000_v13  ;;  %v955_v58 = vmul.f32 -1.442695, %v705_v1 }
 0x31e   :  { %v731_v22 = vadd.f32 1.0, %v1002_v57 }
 0x320   :  { %1009 = vrcp.f32 %v731_v22 }
 0x321   :  { %v1004_v27 = vpop.eup %1003  ;;  %1011 = vpow2.f32 %v954_v23 }
 0x322   :  { %1013 = vrcp.f32 %v732_v17  ;;  %v733_v24 = vadd.f32 1.0, %v1004_v27  ;;  %v1006_v32 = vpop.eup %1005 }
 0x323   :  { %1015 = vpow2.f32 %v955_v58  ;;  %v734_v3 = vadd.f32 1.0, %v1006_v32 }
 0x324   :  { %1017 = vrcp.f32 %v733_v24 }
 0x325   :  { %v1008_v26 = vpop.eup %1007  ;;  %1019 = vpow2.f32 %v956_v11 }
 0x326   :  { %1021 = vrcp.f32 %v734_v3  ;;  %v735_v34 = vadd.f32 1.0, %v1008_v26 }
 0x328   :  { %1023 = vrcp.f32 %v735_v34 }
 0x32a   :  { %v1010_v33 = vpop.eup %1009 }
 0x32b   :  { %755 = vxpose.xlu0.b32.start [1/8] (short) (narrow) %v1010_v33, 8  ;;  %v1012_v61 = vpop.eup %1011  ;;  %v1527_v33 = vld [vmem:[#allocation14_spill] sm:$0xff] }
 0x32c   :  { %v1014_v63 = vpop.eup %1013  ;;  %v736_v60 = vadd.f32 1.0, %v1012_v61 }
 0x32d   :  { %v1016_v25 = vpop.eup %1015 }
 0x32e   :  { %v1018_v48 = vpop.eup %1017  ;;  %1025 = vrcp.f32 %v736_v60  ;;  %v737_v6 = vadd.f32 1.0, %v1016_v25  ;;  %v1529_v25 = vld [vmem:[#allocation16_spill] sm:$0xff] }
 0x32f   :  { %756 = vxpose.xlu0.b32.cont [2/8] (short) (narrow) %v1014_v63, 8  ;;  %v1020_v45 = vpop.eup %1019  ;;  %v1528_v63 = vld [vmem:[#allocation15_spill] sm:$0xff] }
 0x330   :  { %v1022_v49 = vpop.eup %1021  ;;  %v738_v62 = vadd.f32 1.0, %v1020_v45  ;;  %1027 = vrcp.f32 %v737_v6  ;;  %v1530_v45 = vld [vmem:[#allocation17_spill] sm:$0xff] }
 0x332   :  { %v1024_v10 = vpop.eup %1023  ;;  %1029 = vrcp.f32 %v738_v62  ;;  %v1531_v62 = vld [vmem:[#allocation18_spill] sm:$0xff] }
 0x333   :  { %757 = vxpose.xlu0.b32.cont [3/8] (short) (narrow) %v1018_v48, 8 }
 0x337   :  { %758 = vxpose.xlu0.b32.cont [4/8] (short) (narrow) %v1022_v49, 8 }
 0x338   :  { %v1026_v50 = vpop.eup %1025 }
 0x33a   :  { %v1028_v41 = vpop.eup %1027 }
 0x33b   :  { %759 = vxpose.xlu0.b32.cont [5/8] (short) (narrow) %v1024_v10, 8 }
 0x33c   :  { %v1030_v43 = vpop.eup %1029 }
 0x33f   :  { %760 = vxpose.xlu0.b32.cont [6/8] (short) (narrow) %v1026_v50, 8 }
 0x343   :  { %761 = vxpose.xlu0.b32.cont [7/8] (short) (narrow) %v1028_v41, 8  ;;  %v1532_v41 = vld [vmem:[#allocation19_spill] sm:$0xff] }
 0x347   :  { %762 = vxpose.xlu0.b32.end [8/8] (short) (narrow) %v1030_v43, 8 }
 0x3ab   :  { %v771_v42 = vpop.trf.xlu0 }
 0x3ac   :  { %v790_v7 = vrot.slane %v771_v42, %v789_v5  ;;  %v825_v35 = vrot.slane %v771_v42, %v824_v44  ;;  %v1533_v5 = vld [vmem:[#allocation20_spill] sm:$0xff] }
 0x3ae   :  { %792 = vbcast.lane.b32.xlu1 %v790_v7, 256  ;;  %855 = vbcast.lane.b32.xlu0 %v825_v35, 312 }
 0x3b2   :  { %796 = vbcast.lane.b32.xlu1 %v790_v7, 264 }
 0x3b6   :  { %800 = vbcast.lane.b32.xlu1 %v790_v7, 272 }
 0x3ba   :  { %804 = vbcast.lane.b32.xlu1 %v790_v7, 280 }
 0x3be   :  { %808 = vbcast.lane.b32.xlu1 %v790_v7, 288 }
 0x3c2   :  { %812 = vbcast.lane.b32.xlu1 %v790_v7, 296 }
 0x3c6   :  { %816 = vbcast.lane.b32.xlu1 %v790_v7, 304 }
 0x3ca   :  { %820 = vbcast.lane.b32.xlu1 %v790_v7, 312 }
 0x3ce   :  { %827 = vbcast.lane.b32.xlu1 %v825_v35, 256 }
 0x3d2   :  { %831 = vbcast.lane.b32.xlu1 %v825_v35, 264 }
 0x3d6   :  { %835 = vbcast.lane.b32.xlu1 %v825_v35, 272 }
 0x3da   :  { %839 = vbcast.lane.b32.xlu1 %v825_v35, 280 }
 0x3de   :  { %843 = vbcast.lane.b32.xlu1 %v825_v35, 288 }
 0x3e2   :  { %847 = vbcast.lane.b32.xlu1 %v825_v35, 296 }
 0x3e6   :  { %851 = vbcast.lane.b32.xlu1 %v825_v35, 304 }
 0x420   :  { %v793_v51 = vpop.permute.xlu1 %792  ;;  %v856_v37 = vpop.permute.xlu0 %855 }
 0x421   :  { %v857_v36 = vmul.f32 %v793_v51, %v1136_v2  ;;  %v858_v56 = vmul.f32 %v793_v51, %v1140_v4  ;;  %v887_v28 = vmul.f32 %v856_v37, %v1236_v52  ;;  %v888_v29 = vmul.f32 %v856_v37, %v1238_v53 }
 0x423   :  { %889 = vst [vmem:[#allocation5] sm:$0xff] %v857_v36  ;;  %890 = vst [vmem:[#allocation5 + $0x8] sm:$0xff] %v858_v56 }
 0x424   :  { %919 = vst [vmem:[#allocation5 + $0xf0] sm:$0xff] %v887_v28  ;;  %920 = vst [vmem:[#allocation5 + $0xf8] sm:$0xff] %v888_v29  ;;  %v797_v59 = vpop.permute.xlu1 %796 }
 0x425   :  { %v859_v19 = vmul.f32 %v797_v59, %v1148_v8  ;;  %v860_v18 = vmul.f32 %v797_v59, %v1150_v9 }
 0x427   :  { %891 = vst [vmem:[#allocation5 + $0x10] sm:$0xff] %v859_v19  ;;  %892 = vst [vmem:[#allocation5 + $0x18] sm:$0xff] %v860_v18 }
 0x428   :  { %v801_v13 = vpop.permute.xlu1 %800 }
 0x429   :  { %v861_v2 = vmul.f32 %v801_v13, %v1160_v14  ;;  %v862_v4 = vmul.f32 %v801_v13, %v1162_v15 }
 0x42b   :  { %893 = vst [vmem:[#allocation5 + $0x20] sm:$0xff] %v861_v2  ;;  %894 = vst [vmem:[#allocation5 + $0x28] sm:$0xff] %v862_v4 }
 0x42c   :  { %v805_v52 = vpop.permute.xlu1 %804 }
 0x42d   :  { %v863_v53 = vmul.f32 %v805_v52, %v1172_v20  ;;  %v864_v40 = vmul.f32 %v805_v52, %v1174_v21 }
 0x42f   :  { %895 = vst [vmem:[#allocation5 + $0x30] sm:$0xff] %v863_v53  ;;  %896 = vst [vmem:[#allocation5 + $0x38] sm:$0xff] %v864_v40 }
 0x430   :  { %v809_v57 = vpop.permute.xlu1 %808 }
 0x431   :  { %v865_v8 = vmul.f32 %v809_v57, %v1192_v30  ;;  %v866_v9 = vmul.f32 %v809_v57, %v1194_v31 }
 0x433   :  { %897 = vst [vmem:[#allocation5 + $0x40] sm:$0xff] %v865_v8  ;;  %898 = vst [vmem:[#allocation5 + $0x48] sm:$0xff] %v866_v9 }
 0x434   :  { %v813_v22 = vpop.permute.xlu1 %812 }
 0x435   :  { %v867_v14 = vmul.f32 %v813_v22, %v1208_v38  ;;  %v868_v15 = vmul.f32 %v813_v22, %v1210_v39  ;;  %v1521_v39 = vld [vmem:[#allocation8_spill] sm:$0xff] }
 0x437   :  { %899 = vst [vmem:[#allocation5 + $0x50] sm:$0xff] %v867_v14  ;;  %900 = vst [vmem:[#allocation5 + $0x58] sm:$0xff] %v868_v15 }
 0x438   :  { %v817_v23 = vpop.permute.xlu1 %816 }
 0x439   :  { %v869_v20 = vmul.f32 %v817_v23, %v1224_v46  ;;  %v870_v21 = vmul.f32 %v817_v23, %v1226_v47  ;;  %v1522_v46 = vld [vmem:[#allocation9_spill] sm:$0xff]  ;;  %v1523_v47 = vld [vmem:[#allocation10_spill] sm:$0xff] }
 0x43b   :  { %901 = vst [vmem:[#allocation5 + $0x60] sm:$0xff] %v869_v20  ;;  %902 = vst [vmem:[#allocation5 + $0x68] sm:$0xff] %v870_v21 }
 0x43c   :  { %v821_v1 = vpop.permute.xlu1 %820 }
 0x43d   :  { %v871_v30 = vmul.f32 %v821_v1, %v1240_v54  ;;  %v872_v31 = vmul.f32 %v821_v1, %v1242_v55  ;;  %v1524_v54 = vld [vmem:[#allocation11_spill] sm:$0xff]  ;;  %v1525_v55 = vld [vmem:[#allocation12_spill] sm:$0xff] }
 0x43f   :  { %903 = vst [vmem:[#allocation5 + $0x70] sm:$0xff] %v871_v30  ;;  %904 = vst [vmem:[#allocation5 + $0x78] sm:$0xff] %v872_v31 }
 0x440   :  { %v828_v17 = vpop.permute.xlu1 %827 }
 0x441   :  { %v873_v38 = vmul.f32 %v828_v17, %v1132_v0  ;;  %v874_v12 = vmul.f32 %v828_v17, %v1521_v39  ;;  %v1526_v0 = vld [vmem:[#allocation13_spill] sm:$0xff] }
 0x443   :  { %905 = vst [vmem:[#allocation5 + $0x80] sm:$0xff] %v873_v38  ;;  %906 = vst [vmem:[#allocation5 + $0x88] sm:$0xff] %v874_v12 }
 0x444   :  { %v832_v27 = vpop.permute.xlu1 %831 }
 0x445   :  { %v875_v16 = vmul.f32 %v832_v27, %v1522_v46  ;;  %v876_v58 = vmul.f32 %v832_v27, %v1523_v47 }
 0x447   :  { %907 = vst [vmem:[#allocation5 + $0x90] sm:$0xff] %v875_v16  ;;  %908 = vst [vmem:[#allocation5 + $0x98] sm:$0xff] %v876_v58 }
 0x448   :  { %v836_v24 = vpop.permute.xlu1 %835 }
 0x449   :  { %v877_v32 = vmul.f32 %v836_v24, %v1524_v54  ;;  %v878_v11 = vmul.f32 %v836_v24, %v1525_v55 }
 0x44b   :  { %909 = vst [vmem:[#allocation5 + $0xa0] sm:$0xff] %v877_v32  ;;  %910 = vst [vmem:[#allocation5 + $0xa8] sm:$0xff] %v878_v11 }
 0x44c   :  { %v840_v3 = vpop.permute.xlu1 %839 }
 0x44d   :  { %v879_v26 = vmul.f32 %v840_v3, %v1526_v0  ;;  %v880_v34 = vmul.f32 %v840_v3, %v1527_v33 }
 0x44f   :  { %911 = vst [vmem:[#allocation5 + $0xb0] sm:$0xff] %v879_v26  ;;  %912 = vst [vmem:[#allocation5 + $0xb8] sm:$0xff] %v880_v34 }
 0x450   :  { %v844_v61 = vpop.permute.xlu1 %843 }
 0x451   :  { %v881_v60 = vmul.f32 %v844_v61, %v1528_v63  ;;  %v882_v48 = vmul.f32 %v844_v61, %v1529_v25 }
 0x453   :  { %913 = vst [vmem:[#allocation5 + $0xc0] sm:$0xff] %v881_v60  ;;  %914 = vst [vmem:[#allocation5 + $0xc8] sm:$0xff] %v882_v48 }
 0x454   :  { %v848_v6 = vpop.permute.xlu1 %847 }
 0x455   :  { %v883_v49 = vmul.f32 %v848_v6, %v1530_v45  ;;  %v884_v10 = vmul.f32 %v848_v6, %v1531_v62 }
 0x457   :  { %915 = vst [vmem:[#allocation5 + $0xd0] sm:$0xff] %v883_v49  ;;  %916 = vst [vmem:[#allocation5 + $0xd8] sm:$0xff] %v884_v10 }
 0x458   :  { %v852_v50 = vpop.permute.xlu1 %851 }
 0x459   :  { %v885_v43 = vmul.f32 %v852_v50, %v1532_v41  ;;  %v886_v44 = vmul.f32 %v852_v50, %v1533_v5 }
 0x45b   :  { %917 = vst [vmem:[#allocation5 + $0xe0] sm:$0xff] %v885_v43  ;;  %918 = vst [vmem:[#allocation5 + $0xe8] sm:$0xff] %v886_v44 }
 0x45c   :  { %1064 = shalt.err (!%p1061_p12)
}
 0x45d   :  { %s1065_s18 = scalar_lea.hbm %s1494_s5, 4096 }
 0x45e   :  { %p1066_p13 = scmp.ne.s32.totalorder %s1494_s5, %s1065_s18  ;;  %p1069_p0 = scmp.lt.u32.totalorder %s1065_s18, %s1494_s5 }
 0x460   :  { %p1071_p1 = pnand %p1069_p0, %p1066_p13 }
 0x462   :  { %1074 = shalt.err (!%p1071_p1)
}
 0x463   :  { %932 = dma.vmem_to_hbm [thread:$0]  %s927_s1, 4096, %s1494_s5, [#allocation4], %s1080_s28, %s1080_s28, %s1081_s29  }
 0x464   :  { %1077 = dma.done.wait [#allocation4], 4096  }
 0x465   :  { %1078 = vsyncadd [#allocation4], 4294963200 }
 0x466   :  { %936 = vsyncpa [#allocation3], 1 }
 0x467   :  { %937 = vsyncpa [#allocation4], 1 }

</bundles_post_ra>
